<compile_context>
chip_gen: v6e
topology: v6e:2x2x1
jax: 0.10.0
libtpu: 0.0.40
codegen_flags: <defaults>
</compile_context>

<pallas_src>
import jax
import jax.numpy as jnp
from jax.experimental import pallas as pl
from jax.experimental.pallas import tpu as pltpu

N, CIN, H, W = 2, 4, 16, 16
CENC = 32
HO, WO = 8, 8              # backbone output spatial (stride-2 conv)
C1, C2, C3 = 16, 16, 24    # head, head2, head3 output sizes
CTOT = C1 + C2 + C3        # 56 real fused head columns
COUT = 128                 # lane-dense padded output width (unmasked stores)
K = 9 * CIN                # 36 im2col columns for the 3x3 backbone conv
KA = K + 1                 # +1 ones column (folds backbone bias)
CENCA = CENC + 1           # +1 constant-1 column (folds head biases)


def _fused_kernel(p_ref, wbb_ref, wh_ref, out_ref):
    # p_ref:   (TILE, 37)  im2col rows + ones column
    # wbb_ref: (37, 33)    conv weight + bias row; col 32 emits a constant 1
    # wh_ref:  (33, 128)   [w1 | w2 | w3 | 0-pad] + bias row
    # out_ref: (TILE, 128) lane-dense slab; cols 0..55 are real outputs
    enc = jnp.maximum(
        jnp.dot(p_ref[...], wbb_ref[...],
                preferred_element_type=jnp.float32,
                precision=jax.lax.Precision.HIGHEST),
        0.0)                                                   # (TILE, 33); col 32 == 1
    h = jnp.dot(enc, wh_ref[...],
                preferred_element_type=jnp.float32,
                precision=jax.lax.Precision.HIGHEST)           # (TILE, 128), biases included
    # ReLU only on head-1 columns (0..15); head2/head3 (and zero padding) pass through.
    col = jax.lax.broadcasted_iota(jnp.int32, h.shape, 1)
    out_ref[...] = jnp.where(col < C1, jnp.maximum(h, 0.0), h)


def prepare_params(params):
    """Parameter-only transforms, hoisted out of the per-call forward path."""
    # conv weight (O, I, kh, kw) -> (kh*kw*I, O) matching im2col column order.
    w_bb_mat = jnp.transpose(params['w_bb'], (2, 3, 1, 0)).reshape(K, CENC)
    # Augment: row 36 = conv bias (pairs with the ones column of the patches);
    # column 32 = constant-1 generator used to fold the head biases downstream.
    w_bb_aug = jnp.zeros((KA, CENCA), jnp.float32)
    w_bb_aug = w_bb_aug.at[:K, :CENC].set(w_bb_mat)
    w_bb_aug = w_bb_aug.at[K, :CENC].set(params['b_bb'])
    w_bb_aug = w_bb_aug.at[K, CENC].set(1.0)

    # Fused head weights (32, 56), zero-padded to 128 lanes; row 32 carries the
    # head biases. head3's bias is added AFTER pooling in the wrapper (mean
    # commutes with the linear map), so its slots stay zero here.
    w_heads = jnp.concatenate(
        [params['w_h1'].T, params['w_h2'].T, params['w_h3']], axis=1)       # (32, 56)
    b_heads = jnp.concatenate(
        [params['b_h1'], params['b_h2'], jnp.zeros((C3,), jnp.float32)])    # (56,)
    w_heads_aug = jnp.zeros((CENCA, COUT), jnp.float32)
    w_heads_aug = w_heads_aug.at[:CENC, :CTOT].set(w_heads)
    w_heads_aug = w_heads_aug.at[CENC, :CTOT].set(b_heads)

    return {'w_bb_aug': w_bb_aug, 'w_heads_aug': w_heads_aug, 'b_h3': params['b_h3']}


def _pick_tile(rows_p):
    # rows_p is a multiple of 128. Keep the grid >= 2 steps whenever possible so
    # both v7x TensorCores get work; cap tiles at 2048 rows to amortize per-step
    # overhead on large batches while staying far under VMEM on all generations.
    if rows_p == 128:
        return 64                       # grid=(2,); (64,128) tiles stay (8,128)-aligned
    for cand in (2048, 1024, 512, 256):
        if rows_p % cand == 0 and rows_p // cand >= 2:
            return cand
    return 128


@jax.jit
def respose_forward(x_nchw, prepped):
    n = x_nchw.shape[0]
    rows = n * HO * WO

    # im2col for the 3x3 / stride-2 / pad-1 conv. The producing pad/slice/concat
    # chain is allowed to fuse straight into the pallas_call input DMA via
    # allow_input_fusion, avoiding a separate HBM round trip for `patches`.
    # TODO(synk): a fully in-kernel 9-tap accumulation variant would remove this
    # glue entirely but needs sublane-strided in-kernel slicing.
    x = jnp.transpose(x_nchw, (0, 2, 3, 1))                    # (N, H, W, Cin)
    xp = jnp.pad(x, ((0, 0), (1, 1), (1, 1), (0, 0)))
    cols = []
    for dh in range(3):
        for dw in range(3):
            cols.append(xp[:, dh:dh + 2 * HO - 1:2, dw:dw + 2 * WO - 1:2, :])
    patches = jnp.concatenate(cols, axis=-1).reshape(rows, K)   # (rows, 36)
    patches = jnp.concatenate(
        [patches, jnp.ones((rows, 1), jnp.float32)], axis=-1)   # (rows, 37)

    # Pad rows up to a multiple of 128 (never a whole-batch fallback tile).
    rows_p = ((rows + 127) // 128) * 128
    if rows_p != rows:
        patches = jnp.pad(patches, ((0, rows_p - rows), (0, 0)))
    tile = _pick_tile(rows_p)
    grid = (rows_p // tile,)

    slab = pl.pallas_call(
        _fused_kernel,
        out_shape=jax.ShapeDtypeStruct((rows_p, COUT), jnp.float32),
        grid_spec=pltpu.PrefetchScalarGridSpec(
            num_scalar_prefetch=0,
            grid=grid,
            in_specs=[
                pl.BlockSpec((tile, KA), lambda i: (i, 0)),
                pl.BlockSpec((KA, CENCA), lambda i: (0, 0)),
                pl.BlockSpec((CENCA, COUT), lambda i: (0, 0)),
            ],
            out_specs=pl.BlockSpec((tile, COUT), lambda i: (i, 0)),
        ),
        compiler_params=pltpu.CompilerParams(
            dimension_semantics=("parallel",),
            allow_input_fusion=[True, False, False],
        ),
    )(patches, prepped['w_bb_aug'], prepped['w_heads_aug'])

    # Split the lane-dense slab and restore PyTorch NCHW conventions.
    out = slab[:rows, :CTOT].reshape(n, HO * WO, CTOT)
    x_out = jnp.transpose(out[:, :, :C1].reshape(n, HO, WO, C1), (0, 3, 1, 2))
    y_out = jnp.transpose(out[:, :, C1:C1 + C2].reshape(n, HO, WO, C2), (0, 3, 1, 2))
    # head3: mean over positions commutes with the linear map; bias added here.
    z_out = jnp.mean(out[:, :, C1 + C2:], axis=1) + prepped['b_h3']          # (N, 24)
    return x_out, y_out, z_out


def ref_forward(x_nchw, params):
    """Pure-JAX reference mirroring the PyTorch module semantics (NCHW)."""
    hi = jax.lax.Precision.HIGHEST
    enc = jax.lax.conv_general_dilated(
        x_nchw, params['w_bb'], window_strides=(2, 2), padding=((1, 1), (1, 1)),
        dimension_numbers=('NCHW', 'OIHW', 'NCHW'), precision=hi)
    enc = jax.nn.relu(enc + params['b_bb'][None, :, None, None])
    _enc_lat = jnp.mean(enc, axis=(2, 3), keepdims=True)  # avgpool(8,1); unused, as in module
    h1 = jnp.einsum('nchw,oc->nohw', enc, params['w_h1'], precision=hi)
    h1 = jax.nn.relu(h1 + params['b_h1'][None, :, None, None])
    h2 = jnp.einsum('nchw,oc->nohw', enc, params['w_h2'], precision=hi) \
        + params['b_h2'][None, :, None, None]
    pooled = jnp.mean(enc, axis=(2, 3))
    h3 = jnp.dot(pooled, params['w_h3'], precision=hi) + params['b_h3']
    return h1, h2, h3


if __name__ == "__main__":
    key = jax.random.PRNGKey(0)
    ks = jax.random.split(key, 9)
    params = {
        'w_bb': 0.1 * jax.random.normal(ks[0], (CENC, CIN, 3, 3), jnp.float32),
        'b_bb': 0.1 * jax.random.normal(ks[1], (CENC,), jnp.float32),
        'w_h1': 0.1 * jax.random.normal(ks[2], (C1, CENC), jnp.float32),
        'b_h1': 0.1 * jax.random.normal(ks[3], (C1,), jnp.float32),
        'w_h2': 0.1 * jax.random.normal(ks[4], (C2, CENC), jnp.float32),
        'b_h2': 0.1 * jax.random.normal(ks[5], (C2,), jnp.float32),
        'w_h3': 0.1 * jax.random.normal(ks[6], (CENC, C3), jnp.float32),
        'b_h3': 0.1 * jax.random.normal(ks[7], (C3,), jnp.float32),
    }
    x = jax.random.normal(ks[8], (N, CIN, H, W), jnp.float32)

    # Parameter-only transforms done once, outside the per-call jitted path.
    prepped = jax.block_until_ready(prepare_params(params))

    outs = respose_forward(x, prepped)
    outs = jax.block_until_ready(outs)

    refs = ref_forward(x, params)
    for o, r in zip(outs, refs):
        assert o.shape == r.shape and o.dtype == r.dtype
        assert jnp.allclose(o, r, atol=1e-3, rtol=1e-3), float(jnp.max(jnp.abs(o - r)))

    print("KERNEL_OK")
</pallas_src>

<mosaic_0001>
module attributes {stable_mosaic.version = 11 : i64} {
  func.func @_fused_kernel(%arg0: i32, %arg1: memref<64x37xf32, #tpu.memory_space<vmem>>, %arg2: memref<37x33xf32, #tpu.memory_space<vmem>>, %arg3: memref<33x128xf32, #tpu.memory_space<vmem>>, %arg4: memref<64x128xf32, #tpu.memory_space<vmem>>) attributes {dimension_semantics = [#tpu.dimension_semantics<parallel>], iteration_bounds = array<i64: 2>, scalar_prefetch = 0 : i64, scratch_operands = 0 : i64, tpu.core_type = #tpu.core_type<tc>, window_params = [{transform_indices = @transform_0, window_bounds = array<i64: 64, 37>}, {pipeline_mode = #tpu.pipeline_mode<synchronous>, transform_indices = @transform_1, window_bounds = array<i64: 37, 33>}, {pipeline_mode = #tpu.pipeline_mode<synchronous>, transform_indices = @transform_2, window_bounds = array<i64: 33, 128>}, {transform_indices = @transform_3, window_bounds = array<i64: 64, 128>}]} {
    %c0 = arith.constant 0 : index
    %c0_0 = arith.constant 0 : index
    %0 = vector.load %arg1[%c0, %c0_0] : memref<64x37xf32, #tpu.memory_space<vmem>>, vector<64x37xf32>
    %c0_1 = arith.constant 0 : index
    %c0_2 = arith.constant 0 : index
    %1 = vector.load %arg2[%c0_1, %c0_2] : memref<37x33xf32, #tpu.memory_space<vmem>>, vector<37x33xf32>
    %cst = arith.constant dense<0.000000e+00> : vector<64x33xf32>
    %2 = tpu.matmul %0, %1, %cst {dimension_numbers = #tpu.dot_dimension_numbers<[1], [0], [0], [1], [0, 0, 1, 1], [], []>, precision = #tpu.contract_precision<fp32>} : vector<64x37xf32>, vector<37x33xf32>, vector<64x33xf32> -> vector<64x33xf32>
    %cst_3 = arith.constant 0.000000e+00 : f32
    %3 = vector.broadcast %cst_3 : f32 to vector<64x33xf32>
    %4 = arith.maximumf %2, %3 : vector<64x33xf32>
    %c0_4 = arith.constant 0 : index
    %c0_5 = arith.constant 0 : index
    %5 = vector.load %arg3[%c0_4, %c0_5] : memref<33x128xf32, #tpu.memory_space<vmem>>, vector<33x128xf32>
    %cst_6 = arith.constant dense<0.000000e+00> : vector<64x128xf32>
    %6 = tpu.matmul %4, %5, %cst_6 {dimension_numbers = #tpu.dot_dimension_numbers<[1], [0], [0], [1], [0, 0, 1, 1], [], []>, precision = #tpu.contract_precision<fp32>} : vector<64x33xf32>, vector<33x128xf32>, vector<64x128xf32> -> vector<64x128xf32>
    %7 = tpu.iota {dimensions = array<i32: 1>} : vector<64x128xi32>
    %c16_i32 = arith.constant 16 : i32
    %8 = vector.broadcast %c16_i32 : i32 to vector<64x128xi32>
    %9 = arith.cmpi slt, %7, %8 : vector<64x128xi32>
    %cst_7 = arith.constant 0.000000e+00 : f32
    %10 = vector.broadcast %cst_7 : f32 to vector<64x128xf32>
    %11 = arith.maximumf %6, %10 : vector<64x128xf32>
    %12 = arith.select %9, %11, %6 : vector<64x128xi1>, vector<64x128xf32>
    %c0_8 = arith.constant 0 : index
    %c0_9 = arith.constant 0 : index
    %13 = vector.load %arg4[%c0_8, %c0_9] : memref<64x128xf32, #tpu.memory_space<vmem>>, vector<64x128xf32>
    tpu.vector_store %arg4[%c0_8, %c0_9], %12 {strides = array<i32>} : memref<64x128xf32, #tpu.memory_space<vmem>>, vector<64x128xf32>,
    return
  }
  func.func @transform_0(%arg0: i32) -> (i32, i32) {
    %c0_i32 = arith.constant 0 : i32
    %c0_i32_0 = arith.constant 0 : i32
    return %arg0, %c0_i32 : i32, i32
  }
  func.func @transform_1(%arg0: i32) -> (i32, i32) {
    %c0_i32 = arith.constant 0 : i32
    %c0_i32_0 = arith.constant 0 : i32
    %c0_i32_1 = arith.constant 0 : i32
    return %c0_i32, %c0_i32_0 : i32, i32
  }
  func.func @transform_2(%arg0: i32) -> (i32, i32) {
    %c0_i32 = arith.constant 0 : i32
    %c0_i32_0 = arith.constant 0 : i32
    %c0_i32_1 = arith.constant 0 : i32
    return %c0_i32, %c0_i32_0 : i32, i32
  }
  func.func @transform_3(%arg0: i32) -> (i32, i32) {
    %c0_i32 = arith.constant 0 : i32
    %c0_i32_0 = arith.constant 0 : i32
    return %arg0, %c0_i32 : i32, i32
  }
}

</mosaic_0001>

<bundles_post_ra>
// kernel: respose_forward.2
= control target key start
LH: loop header
LB: loop body
LE: loop exit
PB: predicated region body
PF: predicated region fallthrough
CT: control target
= control target key end

     0   :  { %s2511_s17 = smov 0   ;;  %s3051_s0 = inlined_call_operand.vmem [shape: f32[37,33], index: 0, kind: input, shape index: {}]   ;;  %s3052_s1 = inlined_call_operand.vmem [shape: f32[33,128], index: 1, kind: input, shape index: {}]   ;;  %s3053_s2 = inlined_call_operand.vmem [shape: f32[128,36], index: 2, kind: input, shape index: {}]   ;;  %s3054_s3 = inlined_call_operand.<no memory space> [shape: f32[], index: 3, kind: input, shape index: {}]   ;;  %s3055_s4 = inlined_call_operand.vmem [shape: f32[128,128], index: 4, kind: output, shape index: {}]  }
   0x1   :  { %v2509_v0 = vstv %s3054_s3 }
   0x2 LB: > { %s2027_s18 = sadd.s32 4294967295, %s2479_s17   ;;  %p2031_p0 = scmp.ge.s32.totalorder %s2479_s17, 1  ;;  %s2479_s17 = sphi %s2511_s17, %s15_s17  }
   0x3   : > { %p140_p1 = scmp.lt.s32.totalorder %s2479_s17, 3 }
   0x5   : > { %p141_p2 = pnand %p2031_p0, %p140_p1 }
   0x6   : > { %s2032_s24 = sshll.u32 (!%p141_p2), %s2027_s18, 3 }
   0x7   : > { %144 = sbr.rel (%p141_p2) target bundleno = 530 (0x212), region = 32  ;;  %p165_p3 = scmp.lt.s32.totalorder (!%p141_p2), %s2032_s24, 15 }
   0xc   : > { %v274_v1 = vld [vmem:[%s3051_s0 + $0x20] sm:$0x1f]  ;;  %vm300_vm0 = vcmask 1044480   ;;  %v273_v2 = vld [vmem:[%s3051_s0 + $0x18] sm:$0xff]  ;;  %v272_v3 = vld [vmem:[%s3051_s0 + $0x10] sm:$0xff]  ;;  %v177_v4 = vlaneseq  ;;  %s3057_s24 = smov (!%p165_p3, %s2032_s24), 15 }
   0xd   : > { %v302_v5 = vsel %vm300_vm0, %v274_v1, 0  ;;  %v2528_v6 = vand.u32 4294901760, %v273_v2  ;;  %v2530_v7 = vand.u32 4294901760, %v272_v3  ;;  %v271_v8 = vld [vmem:[%s3051_s0 + $0x8] sm:$0xff]  ;;  %v270_v9 = vld [vmem:[%s3051_s0] sm:$0xff]  ;;  %s2033_s29 = sshll.u32 %s3057_s24, 3 }
   0xe   : > { %v2538_v10 = vand.u32 4294901760, %v302_v5  ;;  %v2540_v11 = vand.u32 4294901760, %v271_v8  ;;  %v2542_v12 = vand.u32 4294901760, %v270_v9  ;;  %v2544_v13 = vand.u32 127, %v177_v4  ;;  %s2585_s6 = scalar_lea.vmem %s3053_s2, %s2033_s29  ;;  %s3021_s20 = scalar_lea.vmem %s3055_s4, %s2033_s29 }
   0xf   : > { %v2547_v14 = vsub.f32 %v273_v2, %v2528_v6  ;;  %v2550_v15 = vsub.f32 %v272_v3, %v2530_v7  ;;  %vm275_vm2 = vcmask 302080   ;;  %v176_v26 = vld [vmem:[%s2585_s6] sm:$0xff]  ;;  %v2036_v27 = vld [vmem:[%s2585_s6 + $0x8] sm:$0xff]  ;;  %v2037_v32 = vld [vmem:[%s2585_s6 + $0x10] sm:$0xff]  ;;  %vm1141_vm3 = vcmask 1040384  }
  0x10   : > { %2201 = vmatprep.subr.mxu0 %v2538_v10  ;;  %v2556_v16 = vsub.f32 %v302_v5, %v2538_v10  ;;  %v2559_v17 = vsub.f32 %v271_v8, %v2540_v11  ;;  %v2562_v18 = vsub.f32 %v270_v9, %v2542_v12  ;;  %vm180_vm1 = vcmp.lt.s32.totalorder %v2544_v13, 36  ;;  %v2038_v33 = vld [vmem:[%s2585_s6 + $0x18] sm:$0xff]  ;;  %v2039_v34 = vld [vmem:[%s2585_s6 + $0x20] sm:$0xff]  ;;  %v2040_v43 = vld [vmem:[%s2585_s6 + $0x28] sm:$0xff] }
  0x11   : > { %2202 = vmatpush3.msra.mxu0 %v2538_v10  ;;  %v2566_v19 = vand.u32 4294901760, %v2547_v14  ;;  %v2569_v20 = vand.u32 4294901760, %v2550_v15  ;;  %v181_v30 = vsel %vm180_vm1, %v176_v26, %v2509_v0  ;;  %v191_v38 = vsel %vm180_vm1, %v2036_v27, %v2509_v0  ;;  %v2041_v52 = vld [vmem:[%s2585_s6 + $0x30] sm:$0xff]  ;;  %v2042_v2 = vld [vmem:[%s2585_s6 + $0x38] sm:$0xff] }
  0x12   : > { %2203 = vmatprep.subr.mxu0 %v2528_v6  ;;  %v2575_v21 = vand.u32 4294901760, %v2556_v16  ;;  %v2578_v22 = vand.u32 4294901760, %v2559_v17  ;;  %v2588_v23 = vand.u32 4294901760, %v2562_v18  ;;  %v277_v37 = vsel %vm275_vm2, %v181_v30, 0 }
  0x13   : > { %2204 = vmatpush3.msra.mxu0 %v2528_v6  ;;  %v487_v24 = vsub.f32 %v2547_v14, %v2566_v19  ;;  %v494_v25 = vsub.f32 %v2550_v15, %v2569_v20  ;;  %v2616_v41 = vand.u32 4294901760, %v277_v37  ;;  %v280_v44 = vsel %vm275_vm2, %v191_v38, 0 }
  0x14   : > { %v480_v28 = vsub.f32 %v2556_v16, %v2575_v21  ;;  %2205 = vmatprep.subr.mxu0 %v2530_v7  ;;  %v501_v29 = vsub.f32 %v2559_v17, %v2578_v22  ;;  %v508_v31 = vsub.f32 %v2562_v18, %v2588_v23  ;;  %v202_v45 = vsel %vm180_vm1, %v2037_v32, %v2509_v0 }
  0x15   : > { %v488_v35 = vand.u32 4294901760, %v487_v24  ;;  %2206 = vmatpush3.msra.mxu0 %v2530_v7  ;;  %v495_v36 = vand.u32 4294901760, %v494_v25  ;;  %v213_v46 = vsel %vm180_vm1, %v2038_v33, %v2509_v0  ;;  %v224_v47 = vsel %vm180_vm1, %v2039_v34, %v2509_v0  ;;  %2233 = vmatprep.mubr.f32.mxu1 %v2616_v41 }
  0x16   : > { %v481_v39 = vand.u32 4294901760, %v480_v28  ;;  %2207 = vmatprep.subr.mxu0 %v2540_v11  ;;  %v502_v40 = vand.u32 4294901760, %v501_v29  ;;  %v509_v42 = vand.u32 4294901760, %v508_v31  ;;  %v2632_v48 = vsub.f32 %v277_v37, %v2616_v41 }
  0x17   : > { %2208 = vmatpush3.msra.mxu0 %v2540_v11  ;;  %v2634_v49 = vand.u32 4294901760, %v280_v44  ;;  %v283_v50 = vsel %vm275_vm2, %v202_v45, 0  ;;  %v286_v51 = vsel %vm275_vm2, %v213_v46, 0  ;;  %v289_v55 = vsel %vm275_vm2, %v224_v47, 0 }
  0x18   : > { %2223 = vmatprep.subr.mxu1 %v481_v39  ;;  %2209 = vmatprep.subr.mxu0 %v2542_v12  ;;  %v2640_v53 = vand.u32 4294901760, %v283_v50  ;;  %v2642_v54 = vand.u32 4294901760, %v286_v51  ;;  %v235_v56 = vsel %vm180_vm1, %v2040_v43, %v2509_v0  ;;  %v376_v57 = vand.u32 4294901760, %v2632_v48 }
  0x19   : > { %2224 = vmatpush3.msra.mxu1 %v481_v39  ;;  %2210 = vmatpush3.msra.mxu0 %v2542_v12  ;;  %v2651_v58 = vsub.f32 %v280_v44, %v2634_v49  ;;  %v2653_v59 = vand.u32 4294901760, %v289_v55  ;;  %v292_v60 = vsel %vm275_vm2, %v235_v56, 0  ;;  %v246_v1 = vsel %vm180_vm1, %v2041_v52, %v2509_v0 }
  0x1a   : > { %2225 = vmatprep.subr.mxu1 %v488_v35  ;;  %2245 = vmatprep.subr.mxu0 %v2556_v16  ;;  %v2658_v61 = vsub.f32 %v283_v50, %v2640_v53  ;;  %v2661_v62 = vsub.f32 %v286_v51, %v2642_v54  ;;  %v2663_v63 = vand.u32 4294901760, %v292_v60  ;;  %v377_v3 = vsub.f32 %v2632_v48, %v376_v57 }
  0x1b   : > { %2226 = vmatpush3.msra.mxu1 %v488_v35  ;;  %v386_v4 = vand.u32 4294901760, %v2651_v58  ;;  %v2674_v5 = vsub.f32 %v289_v55, %v2653_v59  ;;  %v295_v8 = vsel %vm275_vm2, %v246_v1, 0  ;;  %v257_v30 = vsel %vm180_vm1, %v2042_v2, %v2509_v0 }
  0x1c   : > { %2227 = vmatprep.subr.mxu1 %v495_v36  ;;  %v396_v9 = vand.u32 4294901760, %v2658_v61  ;;  %v406_v24 = vand.u32 4294901760, %v2661_v62  ;;  %v2680_v25 = vsub.f32 %v292_v60, %v2663_v63  ;;  %v2682_v26 = vand.u32 4294901760, %v295_v8 }
  0x1d   : > { %2228 = vmatpush3.msra.mxu1 %v495_v36  ;;  %v378_v27 = vand.u32 4294901760, %v377_v3  ;;  %v387_v28 = vsub.f32 %v2651_v58, %v386_v4  ;;  %v416_v29 = vand.u32 4294901760, %v2674_v5  ;;  %v298_v36 = vsel %vm275_vm2, %v257_v30, 0 }
  0x1e   : > { %2229 = vmatprep.subr.mxu1 %v502_v40  ;;  %v397_v31 = vsub.f32 %v2658_v61, %v396_v9  ;;  %v407_v32 = vsub.f32 %v2661_v62, %v406_v24  ;;  %v426_v33 = vand.u32 4294901760, %v2680_v25  ;;  %v2699_v34 = vsub.f32 %v295_v8, %v2682_v26 }
  0x1f   : > { %2230 = vmatpush3.msra.mxu1 %v502_v40  ;;  %2211 = vmatprep.mubr.f32.mxu0 %v378_v27  ;;  %v388_v35 = vand.u32 4294901760, %v387_v28  ;;  %v417_v38 = vsub.f32 %v2674_v5, %v416_v29  ;;  %v2710_v44 = vand.u32 4294901760, %v298_v36  ;;  %vm1116_vm4 = vcmask 269312  }
  0x20   : > { %2231 = vmatprep.subr.mxu1 %v509_v42  ;;  %v398_v37 = vand.u32 4294901760, %v397_v31  ;;  %v436_v39 = vand.u32 4294901760, %v2699_v34  ;;  %v408_v40 = vand.u32 4294901760, %v407_v32  ;;  %v427_v43 = vsub.f32 %v2680_v25, %v426_v33 }
  0x21   : > { %2232 = vmatpush3.msra.mxu1 %v509_v42  ;;  %2212 = vmatmul.mubr.f32.vlgmr.msra.gmra.mxu0 %v388_v35  ;;  %v2716_v42 = vsub.f32 %v298_v36, %v2710_v44  ;;  %v418_v45 = vand.u32 4294901760, %v417_v38  ;;  %vm1946_vm5 = vcmp.lt.s32.totalorder %v2544_v13, 16 }
  0x22   : > { %2234 = vmatmul.mubr.f32.vlgmr.msra.gmra.mxu1 %v2634_v49  ;;  %2246 = vmatpush3.msra.mxu0 %v2556_v16  ;;  %v437_v46 = vsub.f32 %v2699_v34, %v436_v39  ;;  %v428_v16 = vand.u32 4294901760, %v427_v43 }
  0x23   : > { %2267 = vmatprep.subr.mxu1 %v2538_v10  ;;  %2214 = vmatprep.mubr.f32.mxu0 %v398_v37  ;;  %v446_v47 = vand.u32 4294901760, %v2716_v42 }
  0x24   : > { %2268 = vmatpush3.msra.mxu1 %v2538_v10  ;;  %2247 = vmatprep.subr.mxu0 %v2547_v14  ;;  %v438_v51 = vand.u32 4294901760, %v437_v46 }
  0x25   : > { %2236 = vmatprep.mubr.f32.mxu1 %v2640_v53  ;;  %2215 = vmatmul.mubr.f32.gmra.mxu0 %v408_v40  ;;  %v447_v50 = vsub.f32 %v2716_v42, %v446_v47 }
  0x26   : > { %2237 = vmatmul.mubr.f32.gmra.mxu1 %v2642_v54  ;;  %2248 = vmatpush3.msra.mxu0 %v2547_v14 }
  0x27   : > { %2269 = vmatprep.subr.mxu1 %v2528_v6  ;;  %2249 = vmatprep.subr.mxu0 %v2550_v15  ;;  %v448_v52 = vand.u32 4294901760, %v447_v50 }
  0x28   : > { %2270 = vmatpush3.msra.mxu1 %v2528_v6  ;;  %2217 = vmatprep.mubr.f32.mxu0 %v418_v45 }
  0x29   : > { %2250 = vmatpush3.msra.mxu0 %v2550_v15  ;;  %2239 = vmatprep.mubr.f32.mxu1 %v2653_v59  ;;  %v1113_v15 = vld [vmem:[%s3052_s1 + $0x10] sm:$0xff] }
  0x2a   : > { %2218 = vmatmul.mubr.f32.gmra.mxu0 %v428_v16  ;;  %2271 = vmatprep.subr.mxu1 %v2530_v7 }
  0x2b   : > { %2240 = vmatmul.mubr.f32.gmra.mxu1 %v2663_v63  ;;  %2251 = vmatprep.subr.mxu0 %v2559_v17 }
  0x2c   : > { %2272 = vmatpush3.msra.mxu1 %v2530_v7  ;;  %2252 = vmatpush3.msra.mxu0 %v2559_v17 }
  0x2d   : > { %2220 = vmatprep.mubr.f32.mxu0 %v438_v51  ;;  %2273 = vmatprep.subr.mxu1 %v2540_v11 }
  0x2e   : > { %2221 = vmatmul.mubr.f32.gmra.mxu0 %v448_v52  ;;  %2242 = vmatprep.mubr.f32.mxu1 %v2682_v26 }
  0x2f   : > { %2253 = vmatprep.subr.mxu0 %v2562_v18  ;;  %2274 = vmatpush3.msra.mxu1 %v2540_v11 }
  0x30   : > { %2254 = vmatpush3.msra.mxu0 %v2562_v18  ;;  %2243 = vmatmul.mubr.f32.gmra.mxu1 %v2710_v44 }
  0x31   : > { %2275 = vmatprep.subr.mxu1 %v2542_v12  ;;  %2255 = vmatprep.mubr.f32.mxu0 %v2632_v48  ;;  %v1111_v48 = vld [vmem:[%s3052_s1] sm:$0xff] }
  0x32   : > { %2276 = vmatpush3.msra.mxu1 %v2542_v12  ;;  %2289 = vmatprep.subr.mxu0 %v2575_v21  ;;  %v2858_v56 = vand.u32 4294901760, %v1111_v48 }
  0x33   : > { %2256 = vmatmul.mubr.f32.vlgmr.msra.gmra.mxu0 %v2651_v58  ;;  %2277 = vmatprep.mubr.f32.mxu1 %v376_v57 }
  0x34   : > { %2290 = vmatpush3.msra.mxu0 %v2575_v21  ;;  %2278 = vmatmul.mubr.f32.vlgmr.msra.gmra.mxu1 %v386_v4  ;;  %v2867_v60 = vsub.f32 %v1111_v48, %v2858_v56 }
  0x35   : > { %2311 = vmatprep.subr.mxu1 %v2538_v10  ;;  %2258 = vmatprep.mubr.f32.mxu0 %v2658_v61 }
  0x36   : > { %2312 = vmatpush3.msra.mxu1 %v2538_v10  ;;  %2291 = vmatprep.subr.mxu0 %v2566_v19 }
  0x37   : > { %2259 = vmatmul.mubr.f32.gmra.mxu0 %v2661_v62  ;;  %2280 = vmatprep.mubr.f32.mxu1 %v396_v9 }
  0x38   : > { %2292 = vmatpush3.msra.mxu0 %v2566_v19  ;;  %2281 = vmatmul.mubr.f32.gmra.mxu1 %v406_v24  ;;  %v2827_v19 = vand.u32 4294901760, %v1113_v15 }
  0x39   : > { %2313 = vmatprep.subr.mxu1 %v2528_v6  ;;  %2293 = vmatprep.subr.mxu0 %v2569_v20 }
  0x3a   : > { %2314 = vmatpush3.msra.mxu1 %v2528_v6  ;;  %2261 = vmatprep.mubr.f32.mxu0 %v2674_v5  ;;  %v1115_v6 = vld [vmem:[%s3052_s1 + $0x20] sm:$0x1] }
  0x3b   : > { %2294 = vmatpush3.msra.mxu0 %v2569_v20  ;;  %2283 = vmatprep.mubr.f32.mxu1 %v416_v29  ;;  %v1112_v20 = vld [vmem:[%s3052_s1 + $0x8] sm:$0xff] }
  0x3c   : > { %2262 = vmatmul.mubr.f32.gmra.mxu0 %v2680_v25  ;;  %2315 = vmatprep.subr.mxu1 %v2530_v7 }
  0x3d   : > { %2284 = vmatmul.mubr.f32.gmra.mxu1 %v426_v33  ;;  %2295 = vmatprep.subr.mxu0 %v2578_v22 }
  0x3e   : > { %2316 = vmatpush3.msra.mxu1 %v2530_v7  ;;  %2296 = vmatpush3.msra.mxu0 %v2578_v22  ;;  %v1143_v7 = vsel %vm1141_vm3, %v1115_v6, 0 }
  0x3f   : > { %2264 = vmatprep.mubr.f32.mxu0 %v2699_v34  ;;  %2317 = vmatprep.subr.mxu1 %v2540_v11  ;;  %v2806_v10 = vand.u32 4294901760, %v1143_v7 }
  0x40   : > { %2265 = vmatmul.mubr.f32.gmra.mxu0 %v2716_v42  ;;  %2286 = vmatprep.mubr.f32.mxu1 %v436_v39 }
  0x41   : > { %2297 = vmatprep.subr.mxu0 %v2588_v23  ;;  %2318 = vmatpush3.msra.mxu1 %v2540_v11  ;;  %v1114_v11 = vld [vmem:[%s3052_s1 + $0x18] sm:$0xff] }
  0x42   : > { %2298 = vmatpush3.msra.mxu0 %v2588_v23  ;;  %2287 = vmatmul.mubr.f32.gmra.mxu1 %v446_v47  ;;  %v2815_v14 = vand.u32 4294901760, %v1114_v11  ;;  %v2840_v23 = vsub.f32 %v1113_v15, %v2827_v19 }
  0x43   : > { %2319 = vmatprep.subr.mxu1 %v2542_v12  ;;  %2299 = vmatprep.mubr.f32.mxu0 %v2616_v41 }
  0x44   : > { %2320 = vmatpush3.msra.mxu1 %v2542_v12  ;;  %2300 = vmatmul.mubr.f32.vlgmr.msra.gmra.mxu0 %v2634_v49  ;;  %v2812_v12 = vsub.f32 %v1143_v7, %v2806_v10  ;;  %v2825_v18 = vsub.f32 %v1114_v11, %v2815_v14 }
  0x45   : > { %2321 = vmatprep.mubr.f32.mxu1 %v2616_v41  ;;  %2302 = vmatprep.mubr.f32.mxu0 %v2640_v53  ;;  %v2842_v41 = vand.u32 4294901760, %v1112_v20 }
  0x46   : > { %2322 = vmatmul.mubr.f32.vlgmr.msra.gmra.mxu1 %v2634_v49  ;;  %2333 = vmatprep.subr.mxu0 %v2806_v10  ;;  %v2822_v17 = vand.u32 4294901760, %v2812_v12  ;;  %v2837_v22 = vand.u32 4294901760, %v2825_v18 }
  0x47   : > { %2324 = vmatprep.mubr.f32.mxu1 %v2640_v53  ;;  %2334 = vmatpush3.msra.mxu0 %v2806_v10  ;;  %v2855_v55 = vsub.f32 %v1112_v20, %v2842_v41 }
  0x48   : > { %2303 = vmatmul.mubr.f32.gmra.mxu0 %v2642_v54  ;;  %2335 = vmatprep.subr.mxu0 %v2815_v14  ;;  %v1321_v21 = vsub.f32 %v2812_v12, %v2822_v17  ;;  %v1328_v53 = vsub.f32 %v2825_v18, %v2837_v22 }
  0x49   : > { %2305 = vmatprep.mubr.f32.mxu0 %v2653_v59  ;;  %2336 = vmatpush3.msra.mxu0 %v2815_v14 }
  0x4a   : > { %2325 = vmatmul.mubr.f32.gmra.mxu1 %v2642_v54  ;;  %2337 = vmatprep.subr.mxu0 %v2827_v19  ;;  %v1322_v49 = vand.u32 4294901760, %v1321_v21  ;;  %v2852_v54 = vand.u32 4294901760, %v2840_v23  ;;  %v1329_v57 = vand.u32 4294901760, %v1328_v53 }
  0x4b   : > { %2327 = vmatprep.mubr.f32.mxu1 %v2653_v59  ;;  %2338 = vmatpush3.msra.mxu0 %v2827_v19  ;;  %v2864_v59 = vand.u32 4294901760, %v2855_v55 }
  0x4c   : > { %2306 = vmatmul.mubr.f32.gmra.mxu0 %v2663_v63  ;;  %2339 = vmatprep.subr.mxu0 %v2842_v41  ;;  %v1335_v58 = vsub.f32 %v2840_v23, %v2852_v54 }
  0x4d   : > { %2308 = vmatprep.mubr.f32.mxu0 %v2682_v26  ;;  %2340 = vmatpush3.msra.mxu0 %v2842_v41  ;;  %v1342_v62 = vsub.f32 %v2855_v55, %v2864_v59 }
  0x4e   : > { %2328 = vmatmul.mubr.f32.gmra.mxu1 %v2663_v63  ;;  %2355 = vmatprep.subr.mxu1 %v1322_v49  ;;  %v1336_v61 = vand.u32 4294901760, %v1335_v58  ;;  %v2874_v63 = vand.u32 4294901760, %v2867_v60 }
  0x4f   : > { %2330 = vmatprep.mubr.f32.mxu1 %v2682_v26  ;;  %2356 = vmatpush3.msra.mxu1 %v1322_v49  ;;  %v1343_v1 = vand.u32 4294901760, %v1342_v62 }
  0x50   : > { %2309 = vmatmul.mubr.f32.gmra.mxu0 %v2710_v44  ;;  %2341 = vmatprep.subr.mxu0 %v2858_v56  ;;  %v1349_v2 = vsub.f32 %v2867_v60, %v2874_v63 }
  0x51   : > { %2357 = vmatprep.subr.mxu1 %v1329_v57  ;;  %2342 = vmatpush3.msra.mxu0 %v2858_v56 }
  0x52   : > { %2331 = vmatmul.mubr.f32.gmra.mxu1 %v2710_v44  ;;  %2377 = vmatprep.subr.mxu0 %v2812_v12  ;;  %v1350_v3 = vand.u32 4294901760, %v1349_v2 }
  0x53   : > { %2358 = vmatpush3.msra.mxu1 %v1329_v57 }
  0x54   : > { %2359 = vmatprep.subr.mxu1 %v1336_v61 }
  0x55   : > { %2360 = vmatpush3.msra.mxu1 %v1336_v61 }
  0x56   : > { %2361 = vmatprep.subr.mxu1 %v1343_v1 }
  0x57   : > { %2362 = vmatpush3.msra.mxu1 %v1343_v1 }
  0x58   : > { %2363 = vmatprep.subr.mxu1 %v1350_v3 }
  0x59   : > { %2364 = vmatpush3.msra.mxu1 %v1350_v3 }
  0x5a   : > { %2399 = vmatprep.subr.mxu1 %v2806_v10 }
  0xe1   : > { %v2213_v4 = vpop.f32.mrf.mxu0 }
  0xe2   : > { %v2235_v5 = vpop.f32.mrf.mxu1 }
  0xe3   : > { %v380_v8 = vpop.f32.mrf.mxu0  ;;  %v553_v16 = vadd.f32 %v2235_v5, %v2213_v4 }
  0xe4   : > { %v546_v9 = vpop.f32.mrf.mxu1 }
  0xe5   : > { %v2216_v24 = vpop.f32.mrf.mxu0  ;;  %v547_v51 = vadd.f32 %v546_v9, %v380_v8 }
  0xe6   : > { %v2238_v25 = vpop.f32.mrf.mxu1 }
  0xe7   : > { %v400_v26 = vpop.f32.mrf.mxu0  ;;  %v565_v7 = vadd.f32 %v2238_v25, %v2216_v24 }
  0xe8   : > { %v558_v27 = vpop.f32.mrf.mxu1 }
  0xe9   : > { %v559_v21 = vadd.f32 %v558_v27, %v400_v26 }
  0xea   : > { %v2219_v28 = vpop.f32.mrf.mxu0 }
  0xeb   : > { %v2241_v29 = vpop.f32.mrf.mxu1 }
  0xec   : > { %v420_v30 = vpop.f32.mrf.mxu0  ;;  %v577_v53 = vadd.f32 %v2241_v29, %v2219_v28 }
  0xed   : > { %v570_v31 = vpop.f32.mrf.mxu1 }
  0xee   : > { %v2222_v32 = vpop.f32.mrf.mxu0  ;;  %v571_v2 = vadd.f32 %v570_v31, %v420_v30 }
  0xf0   : > { %v440_v33 = vpop.f32.mrf.mxu0  ;;  %v2244_v34 = vpop.f32.mrf.mxu1 }
  0xf1   : > { %v589_v24 = vadd.f32 %v2244_v34, %v2222_v32 }
  0xf2   : > { %v582_v35 = vpop.f32.mrf.mxu1 }
  0xf3   : > { %v2257_v36 = vpop.f32.mrf.mxu0 }
  0xf4   : > { %v2279_v37 = vpop.f32.mrf.mxu1  ;;  %v678_v52 = vadd.f32 %v2257_v36, %v553_v16 }
  0xf5   : > { %v670_v38 = vpop.f32.mrf.mxu0 }
  0xf6   : > { %v797_v39 = vpop.f32.mrf.mxu1  ;;  %v671_v11 = vadd.f32 %v670_v38, %v547_v51  ;;  %v806_v48 = vadd.f32 %v2279_v37, %v678_v52 }
  0xf7   : > { %v2260_v40 = vpop.f32.mrf.mxu0 }
  0xf8   : > { %v2282_v43 = vpop.f32.mrf.mxu1  ;;  %v692_v49 = vadd.f32 %v2260_v40, %v565_v7  ;;  %v798_v61 = vadd.f32 %v797_v39, %v671_v11  ;;  %v583_v40 = vadd.f32 %v582_v35, %v440_v33 }
  0xf9   : > { %v684_v44 = vpop.f32.mrf.mxu0 }
  0xfa   : > { %v813_v42 = vpop.f32.mrf.mxu1  ;;  %v685_v62 = vadd.f32 %v684_v44, %v559_v21  ;;  %v822_v8 = vadd.f32 %v2282_v43, %v692_v49 }
  0xfc   : > { %v2263_v45 = vpop.f32.mrf.mxu0  ;;  %v814_v27 = vadd.f32 %v813_v42, %v685_v62 }
  0xfd   : > { %v2285_v46 = vpop.f32.mrf.mxu1  ;;  %v706_v3 = vadd.f32 %v2263_v45, %v577_v53 }
  0xfe   : > { %v698_v47 = vpop.f32.mrf.mxu0 }
  0xff   : > { %v829_v50 = vpop.f32.mrf.mxu1  ;;  %v699_v25 = vadd.f32 %v698_v47, %v571_v2  ;;  %v838_v39 = vadd.f32 %v2285_v46, %v706_v3 }
 0x100   : > { %v2266_v6 = vpop.f32.mrf.mxu0 }
 0x101   : > { %v720_v44 = vadd.f32 %v2266_v6, %v589_v24  ;;  %v830_v52 = vadd.f32 %v829_v50, %v699_v25 }
 0x102   : > { %v712_v15 = vpop.f32.mrf.mxu0  ;;  %v2288_v20 = vpop.f32.mrf.mxu1 }
 0x103   : > { %v713_v32 = vadd.f32 %v712_v15, %v583_v40  ;;  %v854_v35 = vadd.f32 %v2288_v20, %v720_v44 }
 0x104   : > { %v845_v57 = vpop.f32.mrf.mxu1  ;;  %v2301_v58 = vpop.f32.mrf.mxu0 }
 0x105   : > { %v946_v1 = vadd.f32 %v2301_v58, %v806_v48 }
 0x106   : > { %v2323_v4 = vpop.f32.mrf.mxu1  ;;  %v939_v5 = vpop.f32.mrf.mxu0 }
 0x107   : > { %v1064_v9 = vadd.f32 %v2323_v4, %v946_v1  ;;  %v940_v36 = vadd.f32 %v939_v5, %v798_v61  ;;  %v846_v61 = vadd.f32 %v845_v57, %v713_v32 }
 0x108   : > { %v1057_v38 = vpop.f32.mrf.mxu1  ;;  %v2304_v26 = vpop.f32.mrf.mxu0 }
 0x109   : > { %v1104_v37 = vmax.f32 %v1064_v9, 0.0  ;;  %v1058_v28 = vadd.f32 %v1057_v38, %v940_v36  ;;  %v958_v29 = vadd.f32 %v2304_v26, %v822_v8 }
 0x10a   : > { %v2326_v16 = vpop.f32.mrf.mxu1  ;;  %v951_v30 = vpop.f32.mrf.mxu0 }
 0x10b   : > { %v1121_v31 = vsel %vm1116_vm4, %v1104_v37, 0  ;;  %v1103_v45 = vmax.f32 %v1058_v28, 0.0  ;;  %v1076_v43 = vadd.f32 %v2326_v16, %v958_v29  ;;  %v952_v51 = vadd.f32 %v951_v30, %v814_v27 }
 0x10c   : > { %v2881_v34 = vand.u32 4294901760, %v1121_v31  ;;  %v1069_v47 = vpop.f32.mrf.mxu1  ;;  %v2307_v7 = vpop.f32.mrf.mxu0 }
 0x10d   : > { %v1118_v42 = vsel %vm1116_vm4, %v1103_v45, 0  ;;  %v1106_v11 = vmax.f32 %v1076_v43, 0.0  ;;  %v1070_v21 = vadd.f32 %v1069_v47, %v952_v51  ;;  %v970_v33 = vadd.f32 %v2307_v7, %v838_v39 }
 0x10e   : > { %v2885_v46 = vsub.f32 %v1121_v31, %v2881_v34  ;;  %v2887_v6 = vand.u32 4294901760, %v1118_v42  ;;  %v2329_v48 = vpop.f32.mrf.mxu1  ;;  %v963_v49 = vpop.f32.mrf.mxu0 }
 0x10f   : > { %v1127_v50 = vsel %vm1116_vm4, %v1106_v11, 0  ;;  %v1105_v15 = vmax.f32 %v1070_v21, 0.0  ;;  %v1088_v53 = vadd.f32 %v2329_v48, %v970_v33  ;;  %v964_v58 = vadd.f32 %v963_v49, %v830_v52 }
 0x110   : > { %v1227_v62 = vand.u32 4294901760, %v2885_v46  ;;  %v2892_v1 = vsub.f32 %v1118_v42, %v2887_v6  ;;  %v2894_v2 = vand.u32 4294901760, %v1127_v50  ;;  %v1081_v20 = vpop.f32.mrf.mxu1  ;;  %v2310_v3 = vpop.f32.mrf.mxu0  ;;  %2365 = vmatprep.mubr.f32.mxu1 %v2887_v6 }
 0x111   : > { %v1124_v4 = vsel %vm1116_vm4, %v1105_v15, 0  ;;  %v1108_v5 = vmax.f32 %v1088_v53, 0.0  ;;  %v1082_v8 = vadd.f32 %v1081_v20, %v964_v58  ;;  %v982_v9 = vadd.f32 %v2310_v3, %v854_v35  ;;  %2366 = vmatmul.mubr.f32.vlgmr.msra.gmra.mxu1 %v2881_v34 }
 0x112   : > { %v1228_v57 = vsub.f32 %v2885_v46, %v1227_v62  ;;  %v2903_v36 = vsub.f32 %v1127_v50, %v2894_v2  ;;  %v2905_v24 = vand.u32 4294901760, %v1124_v4  ;;  %v2332_v25 = vpop.f32.mrf.mxu1  ;;  %v975_v38 = vpop.f32.mrf.mxu0  ;;  %v1217_v26 = vand.u32 4294901760, %v2892_v1  ;;  %2400 = vmatpush3.msra.mxu1 %v2806_v10 }
 0x113   : > { %v1133_v27 = vsel %vm1116_vm4, %v1108_v5, 0  ;;  %v1107_v37 = vmax.f32 %v1082_v8, 0.0  ;;  %v1100_v28 = vadd.f32 %v2332_v25, %v982_v9  ;;  %v976_v29 = vadd.f32 %v975_v38, %v846_v61  ;;  %2401 = vmatprep.subr.mxu1 %v2815_v14 }
 0x114   : > { %v2912_v40 = vsub.f32 %v1124_v4, %v2905_v24  ;;  %v2914_v39 = vand.u32 4294901760, %v1133_v27  ;;  %v1093_v44 = vpop.f32.mrf.mxu1  ;;  %2368 = vmatprep.mubr.f32.mxu1 %v2905_v24  ;;  %v1218_v16 = vsub.f32 %v2892_v1, %v1217_v26  ;;  %2402 = vmatpush3.msra.mxu1 %v2815_v14  ;;  %v1247_v43 = vand.u32 4294901760, %v2903_v36 }
 0x115   : > { %v1130_v30 = vsel %vm1116_vm4, %v1107_v37, 0  ;;  %v1110_v31 = vmax.f32 %v1100_v28, 0.0  ;;  %v1094_v45 = vadd.f32 %v1093_v44, %v976_v29  ;;  %2369 = vmatmul.mubr.f32.gmra.mxu1 %v2894_v2  ;;  %2403 = vmatprep.subr.mxu1 %v2827_v19  ;;  %v1229_v7 = vand.u32 4294901760, %v1228_v57 }
 0x116   : > { %v2924_v51 = vsub.f32 %v1133_v27, %v2914_v39  ;;  %v2926_v52 = vand.u32 4294901760, %v1130_v30  ;;  %v1219_v32 = vand.u32 4294901760, %v1218_v16  ;;  %v1237_v47 = vand.u32 4294901760, %v2912_v40  ;;  %2404 = vmatpush3.msra.mxu1 %v2827_v19 }
 0x117   : > { %v1139_v42 = vsel %vm1116_vm4, %v1110_v31, 0  ;;  %v1109_v11 = vmax.f32 %v1094_v45, 0.0  ;;  %v1248_v21 = vsub.f32 %v2903_v36, %v1247_v43  ;;  %2405 = vmatprep.subr.mxu1 %v2842_v41 }
 0x118   : > { %v2934_v33 = vsub.f32 %v1130_v30, %v2926_v52  ;;  %v2936_v35 = vand.u32 4294901760, %v1139_v42  ;;  %2343 = vmatprep.mubr.f32.mxu0 %v1219_v32  ;;  %2371 = vmatprep.mubr.f32.mxu1 %v2926_v52  ;;  %v1238_v48 = vsub.f32 %v2912_v40, %v1237_v47  ;;  %v1267_v49 = vand.u32 4294901760, %v2924_v51 }
 0x119   : > { %v1136_v50 = vsel %vm1116_vm4, %v1109_v11, 0  ;;  %2344 = vmatmul.mubr.f32.vlgmr.msra.gmra.mxu0 %v1229_v7  ;;  %2372 = vmatmul.mubr.f32.gmra.mxu1 %v2914_v39  ;;  %v1249_v20 = vand.u32 4294901760, %v1248_v21 }
 0x11a   : > { %v2944_v15 = vsub.f32 %v1139_v42, %v2936_v35  ;;  %v2946_v53 = vand.u32 4294901760, %v1136_v50  ;;  %2378 = vmatpush3.msra.mxu0 %v2812_v12  ;;  %v1239_v58 = vand.u32 4294901760, %v1238_v48  ;;  %2406 = vmatpush3.msra.mxu1 %v2842_v41  ;;  %v1257_v61 = vand.u32 4294901760, %v2934_v33 }
 0x11b   : > { %2379 = vmatprep.subr.mxu0 %v2825_v18  ;;  %2407 = vmatprep.subr.mxu1 %v2858_v56  ;;  %v1268_v3 = vsub.f32 %v2924_v51, %v1267_v49 }
 0x11c   : > { %v1276_v4 = vsub.f32 %v1136_v50, %v2946_v53  ;;  %2346 = vmatprep.mubr.f32.mxu0 %v1239_v58  ;;  %2374 = vmatprep.mubr.f32.mxu1 %v2946_v53  ;;  %v1258_v5 = vsub.f32 %v2934_v33, %v1257_v61  ;;  %v1287_v12 = vand.u32 4294901760, %v2944_v15 }
 0x11d   : > { %2347 = vmatmul.mubr.f32.gmra.mxu0 %v1249_v20  ;;  %2375 = vmatmul.mubr.f32.gmra.mxu1 %v2936_v35  ;;  %v1269_v57 = vand.u32 4294901760, %v1268_v3 }
 0x11e   : > { %2380 = vmatpush3.msra.mxu0 %v2825_v18  ;;  %2409 = vmatprep.mubr.f32.mxu1 %v1217_v26  ;;  %v1259_v8 = vand.u32 4294901760, %v1258_v5  ;;  %v1277_v9 = vand.u32 4294901760, %v1276_v4  ;;  %v1288_v25 = vsub.f32 %v2944_v15, %v1287_v12 }
 0x11f   : > { %2381 = vmatprep.subr.mxu0 %v2840_v23  ;;  %2408 = vmatpush3.msra.mxu1 %v2858_v56 }
 0x120   : > { %2349 = vmatprep.mubr.f32.mxu0 %v1259_v8  ;;  %2382 = vmatpush3.msra.mxu0 %v2840_v23  ;;  %v1278_v38 = vsub.f32 %v1276_v4, %v1277_v9  ;;  %v1289_v26 = vand.u32 4294901760, %v1288_v25 }
 0x121   : > { %2350 = vmatmul.mubr.f32.gmra.mxu0 %v1269_v57  ;;  %2410 = vmatmul.mubr.f32.vlgmr.msra.gmra.mxu1 %v1227_v62 }
 0x122   : > { %2383 = vmatprep.subr.mxu0 %v2855_v55  ;;  %2412 = vmatprep.mubr.f32.mxu1 %v1237_v47  ;;  %v1279_v18 = vand.u32 4294901760, %v1278_v38 }
 0x123   : > { %2384 = vmatpush3.msra.mxu0 %v2855_v55  ;;  %2443 = vmatprep.subr.mxu1 %v2806_v10 }
 0x124   : > { %2352 = vmatprep.mubr.f32.mxu0 %v1279_v18  ;;  %2385 = vmatprep.subr.mxu0 %v2867_v60 }
 0x125   : > { %2353 = vmatmul.mubr.f32.gmra.mxu0 %v1289_v26  ;;  %2413 = vmatmul.mubr.f32.gmra.mxu1 %v1247_v43 }
 0x126   : > { %2386 = vmatpush3.msra.mxu0 %v2867_v60  ;;  %2387 = vmatprep.mubr.f32.mxu0 %v2892_v1 }
 0x127   : > { %2415 = vmatprep.mubr.f32.mxu1 %v1257_v61  ;;  %2421 = vmatprep.subr.mxu0 %v2822_v17 }
 0x128   : > { %2444 = vmatpush3.msra.mxu1 %v2806_v10 }
 0x129   : > { %2388 = vmatmul.mubr.f32.vlgmr.msra.gmra.mxu0 %v2885_v46  ;;  %2416 = vmatmul.mubr.f32.gmra.mxu1 %v1267_v49 }
 0x12a   : > { %2422 = vmatpush3.msra.mxu0 %v2822_v17  ;;  %2445 = vmatprep.subr.mxu1 %v2815_v14 }
 0x12b   : > { %2390 = vmatprep.mubr.f32.mxu0 %v2912_v40  ;;  %2418 = vmatprep.mubr.f32.mxu1 %v1277_v9 }
 0x12c   : > { %2446 = vmatpush3.msra.mxu1 %v2815_v14  ;;  %2423 = vmatprep.subr.mxu0 %v2837_v22 }
 0x12d   : > { %2447 = vmatprep.subr.mxu1 %v2827_v19  ;;  %2391 = vmatmul.mubr.f32.gmra.mxu0 %v2903_v36 }
 0x12e   : > { %2448 = vmatpush3.msra.mxu1 %v2827_v19  ;;  %2424 = vmatpush3.msra.mxu0 %v2837_v22 }
 0x12f   : > { %2419 = vmatmul.mubr.f32.gmra.mxu1 %v1287_v12  ;;  %2449 = vmatprep.subr.mxu1 %v2842_v41 }
 0x130   : > { %2393 = vmatprep.mubr.f32.mxu0 %v2934_v33  ;;  %2450 = vmatpush3.msra.mxu1 %v2842_v41 }
 0x131   : > { %2453 = vmatprep.mubr.f32.mxu1 %v2887_v6  ;;  %2425 = vmatprep.subr.mxu0 %v2852_v54 }
 0x132   : > { %2451 = vmatprep.subr.mxu1 %v2858_v56  ;;  %2426 = vmatpush3.msra.mxu0 %v2852_v54 }
 0x133   : > { %2452 = vmatpush3.msra.mxu1 %v2858_v56  ;;  %2394 = vmatmul.mubr.f32.gmra.mxu0 %v2924_v51 }
 0x134   : > { %2454 = vmatmul.mubr.f32.vlgmr.msra.gmra.mxu1 %v2881_v34  ;;  %2396 = vmatprep.mubr.f32.mxu0 %v1276_v4 }
 0x135   : > { %2427 = vmatprep.subr.mxu0 %v2864_v59  ;;  %2456 = vmatprep.mubr.f32.mxu1 %v2905_v24 }
 0x136   : > { %2428 = vmatpush3.msra.mxu0 %v2864_v59 }
 0x137   : > { %2397 = vmatmul.mubr.f32.gmra.mxu0 %v2944_v15  ;;  %2429 = vmatprep.subr.mxu0 %v2874_v63 }
 0x138   : > { %2457 = vmatmul.mubr.f32.gmra.mxu1 %v2894_v2  ;;  %2430 = vmatpush3.msra.mxu0 %v2874_v63 }
 0x139   : > { %2431 = vmatprep.mubr.f32.mxu0 %v2887_v6  ;;  %2459 = vmatprep.mubr.f32.mxu1 %v2926_v52 }
 0x13b   : > { %2432 = vmatmul.mubr.f32.vlgmr.msra.gmra.mxu0 %v2881_v34 }
 0x13c   : > { %2460 = vmatmul.mubr.f32.gmra.mxu1 %v2914_v39  ;;  %2434 = vmatprep.mubr.f32.mxu0 %v2905_v24 }
 0x13d   : > { %2462 = vmatprep.mubr.f32.mxu1 %v2946_v53 }
 0x13f   : > { %2435 = vmatmul.mubr.f32.gmra.mxu0 %v2894_v2 }
 0x140   : > { %2463 = vmatmul.mubr.f32.gmra.mxu1 %v2936_v35  ;;  %2437 = vmatprep.mubr.f32.mxu0 %v2926_v52 }
 0x143   : > { %2438 = vmatmul.mubr.f32.gmra.mxu0 %v2914_v39 }
 0x144   : > { %2440 = vmatprep.mubr.f32.mxu0 %v2946_v53 }
 0x147   : > { %2441 = vmatmul.mubr.f32.gmra.mxu0 %v2936_v35 }
 0x1d1   : > { %v2367_v10 = vpop.f32.mrf.mxu1 }
 0x1d3   : > { %v1387_v14 = vpop.f32.mrf.mxu1 }
 0x1d5   : > { %v2370_v17 = vpop.f32.mrf.mxu1 }
 0x1d7   : > { %v1399_v19 = vpop.f32.mrf.mxu1 }
 0x1d9   : > { %v2345_v22 = vpop.f32.mrf.mxu0  ;;  %v2373_v23 = vpop.f32.mrf.mxu1 }
 0x1da   : > { %v1394_v30 = vadd.f32 %v2367_v10, %v2345_v22 }
 0x1db   : > { %v1221_v41 = vpop.f32.mrf.mxu0  ;;  %v1411_v54 = vpop.f32.mrf.mxu1 }
 0x1dc   : > { %v1388_v43 = vadd.f32 %v1387_v14, %v1221_v41 }
 0x1dd   : > { %v2348_v55 = vpop.f32.mrf.mxu0  ;;  %v2376_v56 = vpop.f32.mrf.mxu1 }
 0x1de   : > { %v1406_v47 = vadd.f32 %v2370_v17, %v2348_v55 }
 0x1df   : > { %v1241_v59 = vpop.f32.mrf.mxu0  ;;  %v1423_v60 = vpop.f32.mrf.mxu1 }
 0x1e0   : > { %v1400_v21 = vadd.f32 %v1399_v19, %v1241_v59 }
 0x1e1   : > { %v2351_v63 = vpop.f32.mrf.mxu0  ;;  %v2411_v34 = vpop.f32.mrf.mxu1 }
 0x1e2   : > { %v1418_v48 = vadd.f32 %v2373_v23, %v2351_v63 }
 0x1e3   : > { %v1261_v46 = vpop.f32.mrf.mxu0  ;;  %v1638_v6 = vpop.f32.mrf.mxu1 }
 0x1e4   : > { %v1412_v61 = vadd.f32 %v1411_v54, %v1261_v46 }
 0x1e5   : > { %v2354_v62 = vpop.f32.mrf.mxu0  ;;  %v2414_v1 = vpop.f32.mrf.mxu1 }
 0x1e6   : > { %v1430_v8 = vadd.f32 %v2376_v56, %v2354_v62 }
 0x1e7   : > { %v1281_v2 = vpop.f32.mrf.mxu0  ;;  %v1654_v36 = vpop.f32.mrf.mxu1 }
 0x1e8   : > { %v1424_v14 = vadd.f32 %v1423_v60, %v1281_v2 }
 0x1e9   : > { %v2389_v24 = vpop.f32.mrf.mxu0  ;;  %v2417_v27 = vpop.f32.mrf.mxu1 }
 0x1ea   : > { %v1519_v51 = vadd.f32 %v2389_v24, %v1394_v30 }
 0x1eb   : > { %v1511_v37 = vpop.f32.mrf.mxu0  ;;  %v1670_v28 = vpop.f32.mrf.mxu1 }
 0x1ec   : > { %v1512_v7 = vadd.f32 %v1511_v37, %v1388_v43  ;;  %v1647_v35 = vadd.f32 %v2411_v34, %v1519_v51 }
 0x1ed   : > { %v2392_v29 = vpop.f32.mrf.mxu0 }
 0x1ee   : > { %v1533_v33 = vadd.f32 %v2392_v29, %v1406_v47  ;;  %v1639_v58 = vadd.f32 %v1638_v6, %v1512_v7 }
 0x1ef   : > { %v2420_v40 = vpop.f32.mrf.mxu1  ;;  %v1525_v39 = vpop.f32.mrf.mxu0 }
 0x1f0   : > { %v1526_v15 = vadd.f32 %v1525_v39, %v1400_v21  ;;  %v1663_v12 = vadd.f32 %v2414_v1, %v1533_v33 }
 0x1f1   : > { %v3013_v44 = vpop.f32.mrf.mxu1 }
 0x1f2   : > { %v1655_v10 = vadd.f32 %v1654_v36, %v1526_v15 }
 0x1f3   : > { %v2395_v16 = vpop.f32.mrf.mxu0 }
 0x1f4   : > { %v2455_v31 = vpop.f32.mrf.mxu1  ;;  %v1547_v20 = vadd.f32 %v2395_v16, %v1418_v48 }
 0x1f5   : > { %v1539_v45 = vpop.f32.mrf.mxu0 }
 0x1f6   : > { %v1898_v52 = vpop.f32.mrf.mxu1  ;;  %v1540_v9 = vadd.f32 %v1539_v45, %v1412_v61  ;;  %v1679_v22 = vadd.f32 %v2417_v27, %v1547_v20 }
 0x1f7   : > { %v2398_v32 = vpop.f32.mrf.mxu0 }
 0x1f8   : > { %v2458_v42 = vpop.f32.mrf.mxu1  ;;  %v1561_v17 = vadd.f32 %v2398_v32, %v1430_v8  ;;  %v1671_v34 = vadd.f32 %v1670_v28, %v1540_v9 }
 0x1f9   : > { %v1553_v11 = vpop.f32.mrf.mxu0 }
 0x1fa   : > { %v1910_v49 = vpop.f32.mrf.mxu1  ;;  %v1554_v56 = vadd.f32 %v1553_v11, %v1424_v14  ;;  %v1695_v2 = vadd.f32 %v2420_v40, %v1561_v17 }
 0x1fb   : > { %v2433_v50 = vpop.f32.mrf.mxu0 }
 0x1fc   : > { %v1787_v53 = vadd.f32 %v2433_v50, %v1647_v35  ;;  %v2461_v57 = vpop.f32.mrf.mxu1  ;;  %v1687_v39 = vadd.f32 %v3013_v44, %v1554_v56 }
 0x1fd   : > { %v1780_v3 = vpop.f32.mrf.mxu0 }
 0x1fe   : > { %v1905_v4 = vadd.f32 %v2455_v31, %v1787_v53  ;;  %v1781_v5 = vadd.f32 %v1780_v3, %v1639_v58  ;;  %v1922_v59 = vpop.f32.mrf.mxu1 }
 0x1ff   : > { %v2436_v25 = vpop.f32.mrf.mxu0 }
 0x200   : > { %v1948_v38 = vmax.f32 %v1905_v4, 0.0  ;;  %v1899_v18 = vadd.f32 %v1898_v52, %v1781_v5  ;;  %v1799_v26 = vadd.f32 %v2436_v25, %v1663_v12  ;;  %v2464_v29 = vpop.f32.mrf.mxu1 }
 0x201   : > { %v1792_v19 = vpop.f32.mrf.mxu0 }
 0x202   : > { %v1956_v23 = vsel %vm1946_vm5, %v1948_v38, %v1905_v4  ;;  %v1947_v41 = vmax.f32 %v1899_v18, 0.0  ;;  %v1917_v54 = vadd.f32 %v2458_v42, %v1799_v26  ;;  %v1793_v55 = vadd.f32 %v1792_v19, %v1655_v10  ;;  %v1934_v47 = vpop.f32.mrf.mxu1 }
 0x203   : > { %1964 = vst [vmem:[%s3021_s20 + $0x8] sm:$0xff] %v1956_v23  ;;  %v2439_v63 = vpop.f32.mrf.mxu0 }
 0x204   : > { %v1955_v46 = vsel %vm1946_vm5, %v1947_v41, %v1899_v18  ;;  %v1950_v60 = vmax.f32 %v1917_v54, 0.0  ;;  %v1911_v6 = vadd.f32 %v1910_v49, %v1793_v55  ;;  %v1811_v62 = vadd.f32 %v2439_v63, %v1679_v22 }
 0x205   : > { %1963 = vst [vmem:[%s3021_s20] sm:$0xff] %v1955_v46  ;;  %v1804_v1 = vpop.f32.mrf.mxu0 }
 0x206   : > { %v1958_v36 = vsel %vm1946_vm5, %v1950_v60, %v1917_v54  ;;  %v1949_v24 = vmax.f32 %v1911_v6, 0.0  ;;  %v1929_v27 = vadd.f32 %v2461_v57, %v1811_v62  ;;  %v1805_v37 = vadd.f32 %v1804_v1, %v1671_v34 }
 0x207   : > { %1966 = vst [vmem:[%s3021_s20 + $0x18] sm:$0xff] %v1958_v36  ;;  %v2442_v28 = vpop.f32.mrf.mxu0 }
 0x208   : > { %v1957_v16 = vsel %vm1946_vm5, %v1949_v24, %v1911_v6  ;;  %v1952_v30 = vmax.f32 %v1929_v27, 0.0  ;;  %v1923_v31 = vadd.f32 %v1922_v59, %v1805_v37  ;;  %v1823_v40 = vadd.f32 %v2442_v28, %v1695_v2 }
 0x209   : > { %1965 = vst [vmem:[%s3021_s20 + $0x10] sm:$0xff] %v1957_v16  ;;  %v1816_v45 = vpop.f32.mrf.mxu0 }
 0x20a   : > { %v1960_v43 = vsel %vm1946_vm5, %v1952_v30, %v1929_v27  ;;  %v1951_v51 = vmax.f32 %v1923_v31, 0.0  ;;  %v1941_v52 = vadd.f32 %v2464_v29, %v1823_v40  ;;  %v1817_v32 = vadd.f32 %v1816_v45, %v1687_v39 }
 0x20b   : > { %1968 = vst [vmem:[%s3021_s20 + $0x28] sm:$0xff] %v1960_v43 }
 0x20c   : > { %v1959_v44 = vsel %vm1946_vm5, %v1951_v51, %v1923_v31  ;;  %v1954_v7 = vmax.f32 %v1941_v52, 0.0  ;;  %v1935_v42 = vadd.f32 %v1934_v47, %v1817_v32 }
 0x20d   : > { %1967 = vst [vmem:[%s3021_s20 + $0x20] sm:$0xff] %v1959_v44 }
 0x20e   : > { %v1962_v11 = vsel %vm1946_vm5, %v1954_v7, %v1941_v52  ;;  %v1953_v21 = vmax.f32 %v1935_v42, 0.0 }
 0x20f   : > { %1970 = vst [vmem:[%s3021_s20 + $0x38] sm:$0xff] %v1962_v11 }
 0x210   : > { %v1961_v33 = vsel %vm1946_vm5, %v1953_v21, %v1935_v42 }
 0x211   : > { %1969 = vst [vmem:[%s3021_s20 + $0x30] sm:$0xff] %v1961_v33 }
 0x212 PF: > { %s15_s17 = sadd.s32 1, %s2479_s17  }
 0x213   : > { %p12_p4 = scmp.ge.s32.totalorder %s15_s17, 4  }
 0x215   :  { %14 = sbr.rel (!%p12_p4) target bundleno = 2 (0x2), region = 76 }

</bundles_post_ra>
